<compile_context>
chip_gen: v6e
topology: v6e:2x2x1
jax: 0.10.0
libtpu: 0.0.40
codegen_flags: <defaults>
</compile_context>

<pallas_src>
import functools

import jax
import jax.numpy as jnp
from jax.experimental import pallas as pl
from jax.experimental.pallas import tpu as pltpu


def _repeat_last_kernel(x_ref, o_ref, *, output_len: int):
    # x_ref block:  (Bt, D)              -- last time step for Bt batch rows
    # o_ref block:  (Bt, output_len * D) -- lane-dense flattened output
    # out[b, t*D + d] = x[b, d]  <=>  tile the row output_len times along lanes.
    o_ref[...] = jnp.tile(x_ref[...], (1, output_len))


def _choose_batch_tile(B: int, output_len: int, D: int, dtype_bytes: int) -> int:
    """Pick a batch tile targeting ~1 MiB output blocks.

    The second-to-last block dim must be a multiple of 8 (f32 sublane) or equal
    to the full batch extent to satisfy TPU BlockSpec tiling rules. Double
    buffering of a ~1 MiB tile stays far below the scoped-VMEM default on all
    of v5e / v6e / v7x.
    """
    row_bytes = max(1, output_len * D * dtype_bytes)
    bt = max(1, (1 << 20) // row_bytes)
    if bt >= B:
        return B
    bt = max(8, (bt // 8) * 8)
    return bt if bt < B else B


@functools.partial(jax.jit, static_argnames=("output_len",))
def naive_repeat(x, output_len: int):
    B, L, D = x.shape

    # Fetch only the last time step up front (B*D elements); the kernel never
    # touches the rest of the sequence.
    x_last = x[:, L - 1, :]                      # (B, D)

    flat_out = output_len * D
    bt = _choose_batch_tile(B, output_len, D, x.dtype.itemsize)
    grid = (pl.cdiv(B, bt),)

    out_flat = pl.pallas_call(
        functools.partial(_repeat_last_kernel, output_len=output_len),
        out_shape=jax.ShapeDtypeStruct((B, flat_out), x.dtype),
        grid=grid,
        in_specs=[pl.BlockSpec((bt, D), lambda i: (i, 0))],
        out_specs=pl.BlockSpec((bt, flat_out), lambda i: (i, 0)),
        compiler_params=pltpu.CompilerParams(
            dimension_semantics=("parallel",),
        ),
    )(x_last)

    # Free row-major reshape back to the module's (B, output_len, D) layout.
    return out_flat.reshape(B, output_len, D)


if __name__ == "__main__":
    # configs.output_len equivalent
    output_len = 4

    # Small deterministic input: B=2, L=8, D=32
    key = jax.random.PRNGKey(0)
    x = jax.random.normal(key, (2, 8, 32), dtype=jnp.float32)

    out = naive_repeat(x, output_len)
    out = jax.block_until_ready(out)

    # Reference check (plain JAX): repeat last time step output_len times.
    ref = jnp.repeat(x[:, -1:, :], output_len, axis=1)
    assert out.shape == (2, output_len, 32), out.shape
    assert jnp.allclose(out, ref), "mismatch vs reference"

    print("KERNEL_OK")
</pallas_src>

<mosaic_0001>
module attributes {stable_mosaic.version = 11 : i64} {
  func.func @_repeat_last_kernel(%arg0: i32, %arg1: memref<2x32xf32, #tpu.memory_space<vmem>>, %arg2: memref<2x128xf32, #tpu.memory_space<vmem>>) attributes {dimension_semantics = [#tpu.dimension_semantics<parallel>], iteration_bounds = array<i64: 1>, scalar_prefetch = 0 : i64, scratch_operands = 0 : i64, tpu.core_type = #tpu.core_type<tc>, window_params = [{transform_indices = @transform_0, window_bounds = array<i64: 2, 32>}, {transform_indices = @transform_1, window_bounds = array<i64: 2, 128>}]} {
    %c0 = arith.constant 0 : index
    %c0_0 = arith.constant 0 : index
    %0 = vector.load %arg1[%c0, %c0_0] : memref<2x32xf32, #tpu.memory_space<vmem>>, vector<2x32xf32>
    %1 = tpu.concatenate %0, %0, %0, %0 in 1 : vector<2x32xf32>, vector<2x32xf32>, vector<2x32xf32>, vector<2x32xf32> -> vector<2x128xf32>
    %c0_1 = arith.constant 0 : index
    %c0_2 = arith.constant 0 : index
    %2 = vector.load %arg2[%c0_1, %c0_2] : memref<2x128xf32, #tpu.memory_space<vmem>>, vector<2x128xf32>
    tpu.vector_store %arg2[%c0_1, %c0_2], %1 {strides = array<i32>} : memref<2x128xf32, #tpu.memory_space<vmem>>, vector<2x128xf32>,
    return
  }
  func.func @transform_0(%arg0: i32) -> (i32, i32) {
    %c0_i32 = arith.constant 0 : i32
    %c0_i32_0 = arith.constant 0 : i32
    return %arg0, %c0_i32 : i32, i32
  }
  func.func @transform_1(%arg0: i32) -> (i32, i32) {
    %c0_i32 = arith.constant 0 : i32
    %c0_i32_0 = arith.constant 0 : i32
    return %arg0, %c0_i32 : i32, i32
  }
}

</mosaic_0001>

<bundles_post_ra>
// kernel: naive_repeat.1
= control target key start
LH: loop header
LB: loop body
LE: loop exit
PB: predicated region body
PF: predicated region fallthrough
CT: control target
= control target key end

     0   :  { %s33_s8 = smov 32   ;;  %s34_s9 = smov 96   ;;  %vm19_vm0 = vcmask 261120   ;;  %vm21_vm1 = vcmask 523264   ;;  %vm23_vm2 = vcmask 785408   ;;  %s52_s0 = inlined_call_operand.vmem [shape: f32[2,32], index: 0, kind: input, shape index: {}]   ;;  %s53_s1 = inlined_call_operand.vmem [shape: f32[2,128], index: 1, kind: output, shape index: {}]  }
   0x1   :  { %v8_v0 = vld [vmem:[%s52_s0] sm:$0x3]  ;;  %s35_s10 = smov 64  }
   0x2   :  { %10 = vrot.lane.b32.xlu0 %v8_v0, %s33_s8  ;;  %16 = vrot.lane.b32.xlu1 %v8_v0, %s34_s9 }
   0x6   :  { %13 = vrot.lane.b32.xlu0 %v8_v0, %s35_s10 }
  0x74   :  { %v11_v1 = vpop.permute.xlu0 %10  ;;  %v17_v2 = vpop.permute.xlu1 %16 }
  0x75   :  { %v20_v3 = vsel %vm19_vm0, %v8_v0, %v11_v1 }
  0x78   :  { %v14_v4 = vpop.permute.xlu0 %13 }
  0x79   :  { %v22_v5 = vsel %vm21_vm1, %v20_v3, %v14_v4 }
  0x7a   :  { %v24_v6 = vsel %vm23_vm2, %v22_v5, %v17_v2 }
  0x7b   :  { %25 = vst [vmem:[%s53_s1] sm:$0x3] %v24_v6 }

</bundles_post_ra>
